<compile_context>
chip_gen: v7x
topology: tpu7x:2x2x1
jax: 0.10.0
libtpu: 0.0.40
codegen_flags: <defaults>
</compile_context>

<pallas_src>
import jax
import jax.numpy as jnp
from jax.experimental import pallas as pl
from jax.experimental.pallas import tpu as pltpu


def _temperature_logits_kernel(inv_t_ref, x_ref, w_ref, b_ref, o_ref):
    # inv_t_ref: (1,1) f32 in SMEM        (runtime 1/T scalar)
    # x_ref:     (Np, K)  bf16 in VMEM    (flattened, sublane-padded inputs)
    # w_ref:     (K, C)   bf16 in VMEM
    # b_ref:     (1, C)   f32  in VMEM
    # o_ref:     (Np, C)  f32  in VMEM
    logits = jnp.dot(
        x_ref[...], w_ref[...], preferred_element_type=jnp.float32
    ) + b_ref[...]
    o_ref[...] = (logits * inv_t_ref[0, 0]).astype(o_ref.dtype)


def temperature_wrapper_forward(x_nchw, w, b, T=1.0):
    """logits = flatten(x) @ w + b, divided by temperature T.

    x_nchw: [N, C, H, W] float32
    w:      [C*H*W, num_classes] float32
    b:      [num_classes] float32
    T:      python float / scalar temperature (runtime value, no recompile)
    """
    N = x_nchw.shape[0]
    K = x_nchw.shape[1] * x_nchw.shape[2] * x_nchw.shape[3]
    num_classes = w.shape[1]

    # --- wrapper-side glue (layout only, no compute hoisted) ---------------
    # Row-major flatten matches torch.flatten on NCHW.
    x_flat = x_nchw.reshape(N, K).astype(jnp.bfloat16)
    # Pad batch to a multiple of 8 so every vreg/sublane and the output store
    # is full-width (unmasked vst).
    N_pad = ((N + 7) // 8) * 8
    if N_pad != N:
        x_flat = jnp.pad(x_flat, ((0, N_pad - N), (0, 0)))
    w_bf16 = w.astype(jnp.bfloat16)
    b2d = b.reshape(1, num_classes).astype(jnp.float32)
    inv_t = jnp.asarray(1.0 / T, dtype=jnp.float32).reshape(1, 1)

    out = pl.pallas_call(
        _temperature_logits_kernel,
        out_shape=jax.ShapeDtypeStruct((N_pad, num_classes), jnp.float32),
        in_specs=[
            pl.BlockSpec(memory_space=pltpu.MemorySpace.SMEM),   # 1/T scalar
            pl.BlockSpec(memory_space=pltpu.MemorySpace.VMEM),   # x (Np, K)
            pl.BlockSpec(memory_space=pltpu.MemorySpace.VMEM),   # w (K, C)
            pl.BlockSpec(memory_space=pltpu.MemorySpace.VMEM),   # b (1, C)
        ],
        out_specs=pl.BlockSpec(memory_space=pltpu.MemorySpace.VMEM),
    )(inv_t, x_flat, w_bf16, b2d)

    return out[:N]


if __name__ == "__main__":
    key = jax.random.PRNGKey(0)
    kx, kw, kb = jax.random.split(key, 3)

    # Small shapes consistent with the forward: NCHW image input, classifier head.
    N, C, H, W = 2, 4, 16, 16
    num_classes = 128
    K = C * H * W
    T = 2.5

    x = jax.random.normal(kx, (N, C, H, W), dtype=jnp.float32)
    w = jax.random.normal(kw, (K, num_classes), dtype=jnp.float32) * 0.02
    b = jax.random.normal(kb, (num_classes,), dtype=jnp.float32) * 0.1

    out = temperature_wrapper_forward(x, w, b, T=T)
    out = jax.block_until_ready(out)

    # Reference check in plain JAX (full f32). Kernel uses bf16 inputs on the
    # MXU with f32 accumulation, so tolerance is loosened accordingly.
    ref = (x.reshape(N, K) @ w + b) / T
    assert out.shape == (N, num_classes)
    assert jnp.allclose(out, ref, atol=2e-2, rtol=2e-2), "mismatch vs reference"

    print("KERNEL_OK")
</pallas_src>

<mosaic_0001>
module attributes {stable_mosaic.version = 11 : i64} {
  func.func @_temperature_logits_kernel(%arg0: memref<1x1xf32, #tpu.memory_space<smem>>, %arg1: memref<8x1024xbf16, #tpu.memory_space<vmem>>, %arg2: memref<1024x128xbf16, #tpu.memory_space<vmem>>, %arg3: memref<1x128xf32, #tpu.memory_space<vmem>>, %arg4: memref<8x128xf32, #tpu.memory_space<vmem>>) attributes {dimension_semantics = [], scalar_prefetch = 0 : i64, scratch_operands = 0 : i64, tpu.core_type = #tpu.core_type<tc>} {
    %c0 = arith.constant 0 : index
    %c0_0 = arith.constant 0 : index
    %0 = vector.load %arg1[%c0, %c0_0] : memref<8x1024xbf16, #tpu.memory_space<vmem>>, vector<8x1024xbf16>
    %c0_1 = arith.constant 0 : index
    %c0_2 = arith.constant 0 : index
    %1 = vector.load %arg2[%c0_1, %c0_2] : memref<1024x128xbf16, #tpu.memory_space<vmem>>, vector<1024x128xbf16>
    %cst = arith.constant dense<0.000000e+00> : vector<8x128xf32>
    %2 = tpu.matmul %0, %1, %cst {dimension_numbers = #tpu.dot_dimension_numbers<[1], [0], [0], [1], [0, 0, 1, 1], [], []>} : vector<8x1024xbf16>, vector<1024x128xbf16>, vector<8x128xf32> -> vector<8x128xf32>
    %c0_3 = arith.constant 0 : index
    %c0_4 = arith.constant 0 : index
    %3 = vector.load %arg3[%c0_3, %c0_4] : memref<1x128xf32, #tpu.memory_space<vmem>>, vector<1x128xf32>
    %4 = vector.broadcast %3 : vector<1x128xf32> to vector<8x128xf32>
    %5 = arith.addf %2, %4 : vector<8x128xf32>
    %c0_5 = arith.constant 0 : index
    %c0_6 = arith.constant 0 : index
    %6 = memref.load %arg0[%c0_5, %c0_6] : memref<1x1xf32, #tpu.memory_space<smem>>
    %7 = vector.broadcast %6 : f32 to vector<8x128xf32>
    %8 = arith.mulf %5, %7 : vector<8x128xf32>
    %c0_7 = arith.constant 0 : index
    %c0_8 = arith.constant 0 : index
    %9 = vector.load %arg4[%c0_7, %c0_8] : memref<8x128xf32, #tpu.memory_space<vmem>>, vector<8x128xf32>
    tpu.vector_store %arg4[%c0_7, %c0_8], %8 {strides = array<i32>} : memref<8x128xf32, #tpu.memory_space<vmem>>, vector<8x128xf32>,
    return
  }
}

</mosaic_0001>

<bundles_post_ra>
// kernel: tpu_custom_call.1
= control target key start
LH: loop header
LB: loop body
LE: loop exit
PB: predicated region body
PF: predicated region fallthrough
CT: control target
= control target key end

     0   :  { %10 = vsyncpa [#allocation4], 0  ;;  %s1166_s0 = inlined_call_operand.<no memory space> [shape: f32[1,1], index: 0, kind: input, shape index: {}]   ;;  %s1167_s1 = inlined_call_operand.hbm [shape: bf16[8,1024], index: 1, kind: input, shape index: {}]   ;;  %s1168_s2 = inlined_call_operand.hbm [shape: bf16[1024,128], index: 2, kind: input, shape index: {}]   ;;  %s1169_s3 = inlined_call_operand.vmem [shape: f32[1,128], index: 3, kind: input, shape index: {}]   ;;  %s1170_s4 = inlined_call_operand.hbm [shape: f32[8,128], index: 4, kind: output, shape index: {}]  }
   0x1   :  { %11 = vsyncpa [#allocation7], 0 }
   0x2   :  { %12 = vsyncpa [#allocation5], 0  ;;  %s1087_s15 = smov [#allocation3]   ;;  %s1088_s17 = smov [#allocation6]  }
   0x3   :  { %s21_s16 = sshll.u32 %s1087_s15, 4  ;;  %s30_s18 = sshll.u32 %s1088_s17, 4  ;;  %s22_s16 = int_to_ptr.vmem [resolvable:$true] %s21_s16  ;;  %s1117_s18 = int_to_ptr.vmem [resolvable:$true] %s30_s18 }
   0x4   :  { %s1015_s21 = scalar_lea.hbm %s1167_s1, 512 }
   0x5   :  { %p1016_p0 = scmp.ne.s32.totalorder %s1167_s1, %s1015_s21  ;;  %p1019_p1 = scmp.lt.u32.totalorder %s1015_s21, %s1167_s1 }
   0x7   :  { %p1021_p2 = pnand %p1019_p1, %p1016_p0 }
   0x9   :  { %1024 = shalt.err (!%p1021_p2)
}
   0xa   :  { %s1025_s26 = scalar_lea.vmem %s22_s16, 512  ;;  %p1030_p4 = scmp.lt.s32.totalorder %s22_s16, %s22_s16 }
   0xb   :  { %p1026_p3 = scmp.ne.s32.totalorder %s22_s16, %s1025_s26  ;;  %p1031_p5 = scmp.lt.s32.totalorder %s1025_s26, %s1025_s26 }
   0xd   :  { %p1032_p6 = por %p1031_p5, %p1030_p4 }
   0xf   :  { %p1033_p7 = pnand %p1032_p6, %p1026_p3 }
  0x11   :  { %1036 = shalt.err (!%p1033_p7)
}
  0x12   :  { %24 = dma.hbm_to_vmem [thread:$0]  %s1167_s1, 512, %s22_s16, [#allocation4]  }
  0x13   :  { %s1037_s5 = scalar_lea.hbm %s1168_s2, 8192 }
  0x14   :  { %p1038_p8 = scmp.ne.s32.totalorder %s1168_s2, %s1037_s5  ;;  %p1041_p9 = scmp.lt.u32.totalorder %s1037_s5, %s1168_s2 }
  0x16   :  { %p1043_p10 = pnand %p1041_p9, %p1038_p8 }
  0x18   :  { %1046 = shalt.err (!%p1043_p10)
}
  0x19   :  { %s1047_s10 = scalar_lea.vmem %s1117_s18, 8192  ;;  %p1052_p12 = scmp.lt.s32.totalorder %s1117_s18, %s1117_s18 }
  0x1a   :  { %p1048_p11 = scmp.ne.s32.totalorder %s1117_s18, %s1047_s10  ;;  %p1053_p13 = scmp.lt.s32.totalorder %s1047_s10, %s1047_s10 }
  0x1c   :  { %p1054_p0 = por %p1053_p13, %p1052_p12 }
  0x1e   :  { %p1055_p1 = pnand %p1054_p0, %p1048_p11 }
  0x20   :  { %1058 = shalt.err (!%p1055_p1)
}
  0x21   :  { %s1089_s1 = smov 64   ;;  %s1090_s11 = smov 4  }
  0x22   :  { %36 = dma.hbm_to_vmem [thread:$0]  %s1168_s2, 8192, %s1117_s18, [#allocation7], %s1089_s1, %s1089_s1, %s1090_s11  }
  0x23   :  { %1081 = dma.done.wait [#allocation4], 512  }
  0x24   :  { %1082 = vsyncadd [#allocation4], 4294966784 }
  0x25   :  { %1083 = dma.done.wait [#allocation7], 8192  }
  0x26   :  { %1084 = vsyncadd [#allocation7], 4294959104  ;;  %v943_v0 = vld [vmem:[#allocation6 + $0x40] sm:$0xff]   ;;  %v947_v4 = vld [vmem:[#allocation6 + $0x48] sm:$0xff]   ;;  %s1091_s16 = smov [#allocation8]  }
  0x27   :  { %v944_v1 = vld [vmem:[#allocation6 + $0xc0] sm:$0xff]   ;;  %850 = vmatprep.subr.bf16.mxu0 %v943_v0  ;;  %v948_v5 = vld [vmem:[#allocation6 + $0xc8] sm:$0xff]   ;;  %v951_v8 = vld [vmem:[#allocation6 + $0x50] sm:$0xff]   ;;  %s767_s17 = sshll.u32 %s1091_s16, 4  ;;  %s768_s17 = int_to_ptr.vmem [resolvable:$true] %s767_s17 }
  0x28   :  { %v945_v2 = vld [vmem:[#allocation6] sm:$0xff]   ;;  %872 = vmatprep.subr.bf16.mxu1 %v944_v1  ;;  %v949_v6 = vld [vmem:[#allocation6 + $0x8] sm:$0xff]   ;;  %v952_v9 = vld [vmem:[#allocation6 + $0xd0] sm:$0xff]   ;;  %s1059_s18 = scalar_lea.vmem %s768_s17, 128  ;;  %p1064_p3 = scmp.lt.s32.totalorder %s768_s17, %s768_s17 }
  0x29   :  { %v946_v3 = vld [vmem:[#allocation6 + $0x80] sm:$0xff]   ;;  %851 = vmatpush3.bf16.msra.mxu0 %v945_v2  ;;  %v950_v7 = vld [vmem:[#allocation6 + $0x88] sm:$0xff]   ;;  %v953_v10 = vld [vmem:[#allocation6 + $0x10] sm:$0xff]   ;;  %p1060_p2 = scmp.ne.s32.totalorder %s768_s17, %s1059_s18  ;;  %p1065_p4 = scmp.lt.s32.totalorder %s1059_s18, %s1059_s18 }
  0x2a   :  { %873 = vmatpush3.bf16.msra.mxu1 %v946_v3  ;;  %852 = vmatprep.subr.bf16.mxu0 %v947_v4  ;;  %v954_v11 = vld [vmem:[#allocation6 + $0x90] sm:$0xff]   ;;  %v955_v12 = vld [vmem:[#allocation6 + $0x58] sm:$0xff]   ;;  %v959_v16 = vld [vmem:[#allocation6 + $0x60] sm:$0xff]  }
  0x2b   :  { %874 = vmatprep.subr.bf16.mxu1 %v948_v5  ;;  %v956_v13 = vld [vmem:[#allocation6 + $0xd8] sm:$0xff]   ;;  %v960_v17 = vld [vmem:[#allocation6 + $0xe0] sm:$0xff]   ;;  %v963_v20 = vld [vmem:[#allocation6 + $0x68] sm:$0xff]   ;;  %p1066_p5 = por %p1065_p4, %p1064_p3 }
  0x2c   :  { %v957_v14 = vld [vmem:[#allocation6 + $0x18] sm:$0xff]   ;;  %v961_v18 = vld [vmem:[#allocation6 + $0x20] sm:$0xff]   ;;  %v964_v21 = vld [vmem:[#allocation6 + $0xe8] sm:$0xff]  }
  0x2d   :  { %853 = vmatpush3.bf16.msra.mxu0 %v949_v6  ;;  %v958_v15 = vld [vmem:[#allocation6 + $0x98] sm:$0xff]   ;;  %v962_v19 = vld [vmem:[#allocation6 + $0xa0] sm:$0xff]   ;;  %v965_v22 = vld [vmem:[#allocation6 + $0x28] sm:$0xff]   ;;  %p1067_p6 = pnand %p1066_p5, %p1060_p2 }
  0x2e   :  { %875 = vmatpush3.bf16.msra.mxu1 %v950_v7  ;;  %854 = vmatprep.subr.bf16.mxu0 %v951_v8  ;;  %v966_v23 = vld [vmem:[#allocation6 + $0xa8] sm:$0xff]   ;;  %v967_v24 = vld [vmem:[#allocation6 + $0x70] sm:$0xff]   ;;  %v971_v28 = vld [vmem:[#allocation6 + $0x78] sm:$0xff]  }
  0x2f   :  { %876 = vmatprep.subr.bf16.mxu1 %v952_v9  ;;  %v968_v25 = vld [vmem:[#allocation6 + $0xf0] sm:$0xff]   ;;  %v972_v29 = vld [vmem:[#allocation6 + $0xf8] sm:$0xff]   ;;  %v46_v32 = vld [vmem:[#allocation3] sm:$0xff] }
  0x30   :  { %v969_v26 = vld [vmem:[#allocation6 + $0x30] sm:$0xff]   ;;  %v973_v30 = vld [vmem:[#allocation6 + $0x38] sm:$0xff]   ;;  %v47_v33 = vld [vmem:[#allocation3 + $0x8] sm:$0xff]  ;;  %v778_v34 = vcombine.low %v46_v32, %v46_v32  ;;  %v779_v35 = vcombine.high %v46_v32, %v46_v32 }
  0x31   :  { %855 = vmatpush3.bf16.msra.mxu0 %v953_v10  ;;  %v970_v27 = vld [vmem:[#allocation6 + $0xb0] sm:$0xff]   ;;  %v974_v31 = vld [vmem:[#allocation6 + $0xb8] sm:$0xff]   ;;  %v780_v36 = vcombine.low %v47_v33, %v47_v33  ;;  %v781_v37 = vcombine.high %v47_v33, %v47_v33  ;;  %v979_v38 = vld [vmem:[#allocation6 + $0x140] sm:$0xff]  }
  0x32   :  { %877 = vmatpush3.bf16.msra.mxu1 %v954_v11  ;;  %856 = vmatprep.subr.bf16.mxu0 %v955_v12  ;;  %v980_v39 = vld [vmem:[#allocation6 + $0x1c0] sm:$0xff]   ;;  %v983_v42 = vld [vmem:[#allocation6 + $0x148] sm:$0xff]   ;;  %v987_v46 = vld [vmem:[#allocation6 + $0x150] sm:$0xff]  }
  0x33   :  { %878 = vmatprep.subr.bf16.mxu1 %v956_v13  ;;  %629 = vmatprep.mubr.bf16.mxu0 %v779_v35  ;;  %v981_v40 = vld [vmem:[#allocation6 + $0x100] sm:$0xff]   ;;  %v984_v43 = vld [vmem:[#allocation6 + $0x1c8] sm:$0xff]   ;;  %v988_v47 = vld [vmem:[#allocation6 + $0x1d0] sm:$0xff]  }
  0x34   :  { %669 = vmatprep.mubr.bf16.mxu1 %v781_v37  ;;  %v982_v41 = vld [vmem:[#allocation6 + $0x180] sm:$0xff]   ;;  %v985_v44 = vld [vmem:[#allocation6 + $0x108] sm:$0xff]   ;;  %v989_v48 = vld [vmem:[#allocation6 + $0x110] sm:$0xff]  }
  0x35   :  { %857 = vmatpush3.bf16.msra.mxu0 %v957_v14  ;;  %v986_v45 = vld [vmem:[#allocation6 + $0x188] sm:$0xff]   ;;  %v990_v49 = vld [vmem:[#allocation6 + $0x190] sm:$0xff]   ;;  %v991_v50 = vld [vmem:[#allocation6 + $0x158] sm:$0xff]  }
  0x36   :  { %879 = vmatpush3.bf16.msra.mxu1 %v958_v15  ;;  %858 = vmatprep.subr.bf16.mxu0 %v959_v16  ;;  %v992_v51 = vld [vmem:[#allocation6 + $0x1d8] sm:$0xff]   ;;  %v995_v54 = vld [vmem:[#allocation6 + $0x160] sm:$0xff]   ;;  %v999_v58 = vld [vmem:[#allocation6 + $0x168] sm:$0xff]  }
  0x37   :  { %880 = vmatprep.subr.bf16.mxu1 %v960_v17  ;;  %v993_v52 = vld [vmem:[#allocation6 + $0x118] sm:$0xff]   ;;  %v996_v55 = vld [vmem:[#allocation6 + $0x1e0] sm:$0xff]   ;;  %v1000_v59 = vld [vmem:[#allocation6 + $0x1e8] sm:$0xff]  }
  0x38   :  { %v994_v53 = vld [vmem:[#allocation6 + $0x198] sm:$0xff]   ;;  %v997_v56 = vld [vmem:[#allocation6 + $0x120] sm:$0xff]   ;;  %v1001_v60 = vld [vmem:[#allocation6 + $0x128] sm:$0xff]  }
  0x39   :  { %859 = vmatpush3.bf16.msra.mxu0 %v961_v18  ;;  %v998_v57 = vld [vmem:[#allocation6 + $0x1a0] sm:$0xff]   ;;  %v1002_v61 = vld [vmem:[#allocation6 + $0x1a8] sm:$0xff]   ;;  %v1003_v62 = vld [vmem:[#allocation6 + $0x170] sm:$0xff]  }
  0x3a   :  { %881 = vmatpush3.bf16.msra.mxu1 %v962_v19  ;;  %860 = vmatprep.subr.bf16.mxu0 %v963_v20  ;;  %v1004_v63 = vld [vmem:[#allocation6 + $0x1f0] sm:$0xff]   ;;  %v1007_v2 = vld [vmem:[#allocation6 + $0x178] sm:$0xff]   ;;  %v777_v14 = vld [vmem:[%s1169_s3] ss:$0 sm:$0xff] }
  0x3b   :  { %882 = vmatprep.subr.bf16.mxu1 %v964_v21  ;;  %v1005_v0 = vld [vmem:[#allocation6 + $0x130] sm:$0xff]   ;;  %v1008_v3 = vld [vmem:[#allocation6 + $0x1f8] sm:$0xff]  }
  0x3c   :  { %v1006_v1 = vld [vmem:[#allocation6 + $0x1b0] sm:$0xff]   ;;  %v1009_v4 = vld [vmem:[#allocation6 + $0x138] sm:$0xff]  }
  0x3d   :  { %861 = vmatpush3.bf16.msra.mxu0 %v965_v22  ;;  %v1010_v5 = vld [vmem:[#allocation6 + $0x1b8] sm:$0xff]   ;;  %v48_v6 = vld [vmem:[#allocation3 + $0x10] sm:$0xff] }
  0x3e   :  { %883 = vmatpush3.bf16.msra.mxu1 %v966_v23  ;;  %862 = vmatprep.subr.bf16.mxu0 %v967_v24  ;;  %v782_v7 = vcombine.low %v48_v6, %v48_v6  ;;  %v783_v8 = vcombine.high %v48_v6, %v48_v6  ;;  %v49_v9 = vld [vmem:[#allocation3 + $0x18] sm:$0xff] }
  0x3f   :  { %884 = vmatprep.subr.bf16.mxu1 %v968_v25  ;;  %v784_v10 = vcombine.low %v49_v9, %v49_v9  ;;  %v785_v11 = vcombine.high %v49_v9, %v49_v9 }
  0x41   :  { %863 = vmatpush3.bf16.msra.mxu0 %v969_v26 }
  0x42   :  { %885 = vmatpush3.bf16.msra.mxu1 %v970_v27  ;;  %864 = vmatprep.subr.bf16.mxu0 %v971_v28 }
  0x43   :  { %886 = vmatprep.subr.bf16.mxu1 %v972_v29 }
  0x45   :  { %865 = vmatpush3.bf16.msra.mxu0 %v973_v30 }
  0x46   :  { %887 = vmatpush3.bf16.msra.mxu1 %v974_v31  ;;  %894 = vmatprep.subr.bf16.mxu0 %v979_v38 }
  0x47   :  { %916 = vmatprep.subr.bf16.mxu1 %v980_v39 }
  0x48   :  { %630 = vmatmul.mubr.bf16.vlgmr.msra.gmra.mrb[0].mxu0 %v778_v34 }
  0x49   :  { %670 = vmatmul.mubr.bf16.vlgmr.msra.gmra.mrb[0].mxu1 %v780_v36  ;;  %895 = vmatpush3.bf16.msra.mxu0 %v981_v40  ;;  %v758_v36 = vstv %s1166_s0 }
  0x4a   :  { %917 = vmatpush3.bf16.msra.mxu1 %v982_v41  ;;  %896 = vmatprep.subr.bf16.mxu0 %v983_v42 }
  0x4b   :  { %918 = vmatprep.subr.bf16.mxu1 %v984_v43  ;;  %709 = vmatprep.mubr.bf16.mxu0 %v783_v8 }
  0x4c   :  { %749 = vmatprep.mubr.bf16.mxu1 %v785_v11 }
  0x4d   :  { %897 = vmatpush3.bf16.msra.mxu0 %v985_v44 }
  0x4e   :  { %919 = vmatpush3.bf16.msra.mxu1 %v986_v45  ;;  %898 = vmatprep.subr.bf16.mxu0 %v987_v46 }
  0x4f   :  { %920 = vmatprep.subr.bf16.mxu1 %v988_v47 }
  0x51   :  { %899 = vmatpush3.bf16.msra.mxu0 %v989_v48 }
  0x52   :  { %921 = vmatpush3.bf16.msra.mxu1 %v990_v49  ;;  %900 = vmatprep.subr.bf16.mxu0 %v991_v50 }
  0x53   :  { %922 = vmatprep.subr.bf16.mxu1 %v992_v51 }
  0x55   :  { %901 = vmatpush3.bf16.msra.mxu0 %v993_v52 }
  0x56   :  { %923 = vmatpush3.bf16.msra.mxu1 %v994_v53  ;;  %902 = vmatprep.subr.bf16.mxu0 %v995_v54 }
  0x57   :  { %924 = vmatprep.subr.bf16.mxu1 %v996_v55 }
  0x59   :  { %903 = vmatpush3.bf16.msra.mxu0 %v997_v56 }
  0x5a   :  { %925 = vmatpush3.bf16.msra.mxu1 %v998_v57  ;;  %904 = vmatprep.subr.bf16.mxu0 %v999_v58 }
  0x5b   :  { %926 = vmatprep.subr.bf16.mxu1 %v1000_v59 }
  0x5d   :  { %905 = vmatpush3.bf16.msra.mxu0 %v1001_v60 }
  0x5e   :  { %927 = vmatpush3.bf16.msra.mxu1 %v1002_v61  ;;  %906 = vmatprep.subr.bf16.mxu0 %v1003_v62 }
  0x5f   :  { %928 = vmatprep.subr.bf16.mxu1 %v1004_v63 }
  0x61   :  { %907 = vmatpush3.bf16.msra.mxu0 %v1005_v0 }
  0x62   :  { %929 = vmatpush3.bf16.msra.mxu1 %v1006_v1  ;;  %908 = vmatprep.subr.bf16.mxu0 %v1007_v2 }
  0x63   :  { %930 = vmatprep.subr.bf16.mxu1 %v1008_v3 }
  0x65   :  { %909 = vmatpush3.bf16.msra.mxu0 %v1009_v4 }
  0x66   :  { %931 = vmatpush3.bf16.msra.mxu1 %v1010_v5 }
  0x68   :  { %710 = vmatmul.mubr.bf16.vlgmr.msra.gmra.mrb[4].mxu0 %v782_v7 }
  0x69   :  { %750 = vmatmul.mubr.bf16.vlgmr.msra.gmra.mrb[4].mxu1 %v784_v10 }
 0x11b   :  { %v866_v12 = vpop.f32.mrb[0].mxu0 }
 0x11c   :  { %v888_v13 = vpop.f32.mrb[0].mxu1  ;;  %v867_v15 = vpop.f32.mrb[1].mxu0 }
 0x11d   :  { %v889_v16 = vpop.f32.mrb[1].mxu1  ;;  %v868_v17 = vadd.f32 %v867_v15, %v866_v12  ;;  %v869_v19 = vpop.f32.mrb[2].mxu0 }
 0x11e   :  { %v890_v18 = vadd.f32 %v889_v16, %v888_v13  ;;  %v891_v20 = vpop.f32.mrb[2].mxu1  ;;  %v870_v21 = vpop.f32.mrb[3].mxu0 }
 0x11f   :  { %v892_v22 = vpop.f32.mrb[3].mxu1  ;;  %v632_v23 = vadd.f32 %v868_v17, %v777_v14 }
 0x121   :  { %v672_v24 = vadd.f32 %v890_v18, %v632_v23 }
 0x13b   :  { %v910_v25 = vpop.f32.mrb[4].mxu0 }
 0x13c   :  { %v932_v26 = vpop.f32.mrb[4].mxu1  ;;  %v911_v27 = vpop.f32.mrb[5].mxu0 }
 0x13d   :  { %v933_v28 = vpop.f32.mrb[5].mxu1  ;;  %v912_v29 = vadd.f32 %v911_v27, %v910_v25  ;;  %v913_v31 = vpop.f32.mrb[6].mxu0 }
 0x13e   :  { %v934_v30 = vadd.f32 %v933_v28, %v932_v26  ;;  %v935_v32 = vpop.f32.mrb[6].mxu1  ;;  %v914_v33 = vpop.f32.mrb[7].mxu0 }
 0x13f   :  { %v936_v34 = vpop.f32.mrb[7].mxu1  ;;  %v712_v35 = vadd.f32 %v912_v29, %v672_v24 }
 0x141   :  { %v752_v37 = vadd.f32 %v934_v30, %v712_v35 }
 0x143   :  { %v759_v38 = vmul.f32 %v758_v36, %v752_v37 }
 0x145   :  { %760 = vst [vmem:[#allocation8] sm:$0xff] %v759_v38 }
 0x146   :  { %1070 = shalt.err (!%p1067_p6)
}
 0x147   :  { %s1071_s21 = scalar_lea.hbm %s1170_s4, 128 }
 0x148   :  { %p1072_p7 = scmp.ne.s32.totalorder %s1170_s4, %s1071_s21  ;;  %p1075_p8 = scmp.lt.u32.totalorder %s1071_s21, %s1170_s4 }
 0x14a   :  { %p1077_p9 = pnand %p1075_p8, %p1072_p7 }
 0x14c   :  { %1080 = shalt.err (!%p1077_p9)
}
 0x14d   :  { %770 = dma.vmem_to_hbm [thread:$0]  %s768_s17, 128, %s1170_s4, [#allocation5]  }
 0x14e   :  { %1085 = dma.done.wait [#allocation5], 128  }
 0x14f   :  { %1086 = vsyncadd [#allocation5], 4294967168 }
 0x150   :  { %774 = vsyncpa [#allocation4], 1 }
 0x151   :  { %775 = vsyncpa [#allocation7], 1 }
 0x152   :  { %776 = vsyncpa [#allocation5], 1 }

</bundles_post_ra>
